<compile_context>
chip_gen: v7x
topology: tpu7x:2x2x1
jax: 0.10.0
libtpu: 0.0.40
codegen_flags: <defaults>
</compile_context>

<pallas_src>
import functools

import jax
import jax.numpy as jnp
from jax.experimental import pallas as pl
from jax.experimental.pallas import tpu as pltpu


_VMEM_LIMIT_BYTES = 32 * 1024 * 1024   # scoped-VMEM request; safe on v5e/v6e/v7x
_SMALL_N = 256                          # below this: one block covering everything
_MAX_TILE_ROWS = 1024


# ----------------------------- Pallas kernel ------------------------------ #
def _token_type_gate_kernel(x_ref, w_ref, b_ref, out_ref, *, num_types):
    # x_ref:   (tn, D)   input rows (streamed, input dtype)
    # w_ref:   (D, 2T)   [gate_w | cls_w]   (resident across grid steps)
    # b_ref:   (1, 2T)   [gate_b | cls_b]   (f32, resident)
    # out_ref: (tn, 1)   combined gate (f32)
    x = x_ref[...]

    # One fused MXU pass for both heads; accumulate in f32.
    y = jnp.dot(x, w_ref[...], preferred_element_type=jnp.float32) + b_ref[...]
    g = y[:, :num_types]                       # per-type gate logits    (tn, T)
    z = y[:, num_types:]                       # type-classifier logits  (tn, T)

    # sigmoid gate per type (exp runs on the EUP)
    gates = 1.0 / (1.0 + jnp.exp(-g))

    # softmax over the type axis
    z = z - jnp.max(z, axis=-1, keepdims=True)
    e = jnp.exp(z)
    probs = e / jnp.sum(e, axis=-1, keepdims=True)

    # combined gate = sum_t gates[:, t] * probs[:, t]  -> (tn, 1)
    combined = jnp.sum(gates * probs, axis=-1, keepdims=True)
    out_ref[...] = combined.astype(out_ref.dtype)


def _choose_tile_rows(n_rows, d, itemsize):
    """Row-tile size for the streamed x block.

    Big enough to amortize per-grid-step overhead, small enough that the
    double-buffered x tile stays well inside the scoped-VMEM budget, a multiple
    of 128, and capped so the 'parallel' axis has at least two steps (v7x
    megacore)."""
    budget = _VMEM_LIMIT_BYTES // 2                  # headroom: weights/out/etc.
    cap = max(128, budget // (2 * d * itemsize))     # 2x = double buffering
    tn = max(128, min(_MAX_TILE_ROWS, cap) // 128 * 128)
    two_steps = (pl.cdiv(n_rows, 2) + 127) // 128 * 128
    return max(128, min(tn, two_steps))


def token_type_gate_pallas(x2d, w_cat, b_cat, num_types, *, out_dtype=jnp.float32):
    """x2d: (N, D); w_cat: (D, 2T) = [gate_w | cls_w]; b_cat: (1, 2T) -> (N, 1)."""
    n, d = x2d.shape
    two_t = w_cat.shape[1]
    assert two_t == 2 * num_types

    # Weights ride in x's dtype so bf16 inputs hit the MXU natively.  This cast
    # is a no-op when the dtypes already match (default f32 path).
    if w_cat.dtype != x2d.dtype:
        w_cat = w_cat.astype(x2d.dtype)
    if b_cat.dtype != jnp.float32:
        b_cat = b_cat.astype(jnp.float32)

    if n < _SMALL_N:
        tn = n                                 # single block == full array
    else:
        tn = _choose_tile_rows(n, d, x2d.dtype.itemsize)
    grid = (pl.cdiv(n, tn),)

    kernel = functools.partial(_token_type_gate_kernel, num_types=num_types)
    out = pl.pallas_call(
        kernel,
        out_shape=jax.ShapeDtypeStruct((n, 1), out_dtype),
        grid_spec=pltpu.PrefetchScalarGridSpec(
            num_scalar_prefetch=0,
            grid=grid,
            in_specs=[
                pl.BlockSpec((tn, d), lambda i: (i, 0)),       # x rows (streamed)
                pl.BlockSpec((d, two_t), lambda i: (0, 0)),    # fused weights (resident)
                pl.BlockSpec((1, two_t), lambda i: (0, 0)),    # fused biases (resident)
            ],
            out_specs=pl.BlockSpec((tn, 1), lambda i: (i, 0)),
        ),
        compiler_params=pltpu.CompilerParams(
            dimension_semantics=("parallel",),
            vmem_limit_bytes=_VMEM_LIMIT_BYTES),
    )(x2d, w_cat, b_cat)
    return out


# ------------------------------ Module glue -------------------------------- #
def _xavier_uniform(key, shape, fan_in, fan_out):
    limit = (6.0 / (fan_in + fan_out)) ** 0.5
    return jax.random.uniform(key, shape, jnp.float32, -limit, limit)


class TokenTypeGate:
    """JAX/Pallas port of the PyTorch `TokenTypeGate` module (forward pass)."""

    def __init__(self, dims, num_types=4, key=None, param_dtype=jnp.float32):
        if key is None:
            key = jax.random.PRNGKey(0)
        self.dims = dims
        self.num_types = num_types
        keys = jax.random.split(key, num_types + 1)
        # num_types x Linear(dims, 1) gate heads (xavier_uniform, zero bias),
        # stacked into a (dims, num_types) matrix.
        gate_cols = [_xavier_uniform(keys[t], (dims, 1), dims, 1)
                     for t in range(num_types)]
        self.gate_w = jnp.concatenate(gate_cols, axis=1)
        self.gate_b = jnp.zeros((num_types,), jnp.float32)
        # type classifier Linear(dims, num_types) (xavier_uniform, zero bias).
        self.cls_w = _xavier_uniform(keys[num_types], (dims, num_types),
                                     dims, num_types)
        self.cls_b = jnp.zeros((num_types,), jnp.float32)
        # Kernel-side fused parameters, built ONCE here (no per-call concat/cast):
        # columns [:T] -> gate heads, columns [T:] -> type classifier.
        self.w_cat = jnp.concatenate([self.gate_w, self.cls_w],
                                     axis=1).astype(param_dtype)
        self.b_cat = jnp.concatenate([self.gate_b, self.cls_b]
                                     ).reshape(1, 2 * num_types).astype(jnp.float32)

    def __call__(self, x):
        # x: (..., dims) -> (..., 1)
        lead = x.shape[:-1]
        x2d = x.reshape(-1, self.dims)
        out = token_type_gate_pallas(x2d, self.w_cat, self.b_cat, self.num_types)
        return out.reshape(lead + (1,)).astype(x.dtype)


# ------------------------------ reference ---------------------------------- #
def _ref_forward(x, gate_w, gate_b, cls_w, cls_b):
    probs = jax.nn.softmax(jnp.dot(x, cls_w, precision="highest") + cls_b, axis=-1)
    gates = jax.nn.sigmoid(jnp.dot(x, gate_w, precision="highest") + gate_b)
    return jnp.sum(gates * probs, axis=-1, keepdims=True)


# --------------------------------- main ------------------------------------ #
if __name__ == "__main__":
    key = jax.random.PRNGKey(0)
    k_x, k_w, k_x2, k_w2 = jax.random.split(key, 4)

    # --- small shape: single-block path (module defaults) ---
    B, S, dims, num_types = 2, 8, 64, 4
    mod = TokenTypeGate(dims, num_types=num_types, key=k_w)
    x = jax.random.normal(k_x, (B, S, dims), dtype=jnp.float32)
    out = jax.block_until_ready(mod(x))
    ref = _ref_forward(x, mod.gate_w, mod.gate_b, mod.cls_w, mod.cls_b)
    assert out.shape == (B, S, 1) and out.dtype == jnp.float32
    assert jnp.max(jnp.abs(out - ref)) < 1e-5

    # --- larger, non-tile-multiple shape: tiled path with a ragged last block ---
    B2, S2, dims2 = 3, 250, 128          # N = 750 rows -> 2 "parallel" grid steps
    mod2 = TokenTypeGate(dims2, num_types=num_types, key=k_w2)
    x2 = jax.random.normal(k_x2, (B2, S2, dims2), dtype=jnp.float32)
    out2 = jax.block_until_ready(mod2(x2))
    ref2 = _ref_forward(x2, mod2.gate_w, mod2.gate_b, mod2.cls_w, mod2.cls_b)
    assert out2.shape == (B2, S2, 1)
    assert jnp.max(jnp.abs(out2 - ref2)) < 1e-4

    print("KERNEL_OK")
</pallas_src>

<mosaic_0001>
module attributes {stable_mosaic.version = 11 : i64} {
  func.func @_token_type_gate_kernel(%arg0: i32, %arg1: memref<16x64xf32, #tpu.memory_space<vmem>>, %arg2: memref<64x8xf32, #tpu.memory_space<vmem>>, %arg3: memref<1x8xf32, #tpu.memory_space<vmem>>, %arg4: memref<16x1xf32, #tpu.memory_space<vmem>>) attributes {dimension_semantics = [#tpu.dimension_semantics<parallel>], iteration_bounds = array<i64: 1>, scalar_prefetch = 0 : i64, scratch_operands = 0 : i64, tpu.core_type = #tpu.core_type<tc>, window_params = [{transform_indices = @transform_0, window_bounds = array<i64: 16, 64>}, {pipeline_mode = #tpu.pipeline_mode<synchronous>, transform_indices = @transform_1, window_bounds = array<i64: 64, 8>}, {pipeline_mode = #tpu.pipeline_mode<synchronous>, transform_indices = @transform_2, window_bounds = array<i64: 1, 8>}, {transform_indices = @transform_3, window_bounds = array<i64: 16, 1>}]} {
    %c0 = arith.constant 0 : index
    %c0_0 = arith.constant 0 : index
    %0 = vector.load %arg1[%c0, %c0_0] : memref<16x64xf32, #tpu.memory_space<vmem>>, vector<16x64xf32>
    %c0_1 = arith.constant 0 : index
    %c0_2 = arith.constant 0 : index
    %1 = vector.load %arg2[%c0_1, %c0_2] : memref<64x8xf32, #tpu.memory_space<vmem>>, vector<64x8xf32>
    %cst = arith.constant dense<0.000000e+00> : vector<16x8xf32>
    %2 = tpu.matmul %0, %1, %cst {dimension_numbers = #tpu.dot_dimension_numbers<[1], [0], [0], [1], [0, 0, 1, 1], [], []>} : vector<16x64xf32>, vector<64x8xf32>, vector<16x8xf32> -> vector<16x8xf32>
    %c0_3 = arith.constant 0 : index
    %c0_4 = arith.constant 0 : index
    %3 = vector.load %arg3[%c0_3, %c0_4] : memref<1x8xf32, #tpu.memory_space<vmem>>, vector<1x8xf32>
    %4 = vector.broadcast %3 : vector<1x8xf32> to vector<16x8xf32>
    %5 = arith.addf %2, %4 : vector<16x8xf32>
    %6 = vector.extract_strided_slice %5 {offsets = [0, 0], sizes = [16, 4], strides = [1, 1]} : vector<16x8xf32> to vector<16x4xf32>
    %7 = vector.extract_strided_slice %5 {offsets = [0, 4], sizes = [16, 4], strides = [1, 1]} : vector<16x8xf32> to vector<16x4xf32>
    %cst_5 = arith.constant 0.000000e+00 : f32
    %8 = vector.broadcast %cst_5 : f32 to vector<16x4xf32>
    %9 = arith.subf %8, %6 : vector<16x4xf32>
    %10 = math.exp %9 : vector<16x4xf32>
    %cst_6 = arith.constant 1.000000e+00 : f32
    %11 = vector.broadcast %cst_6 : f32 to vector<16x4xf32>
    %12 = arith.addf %11, %10 : vector<16x4xf32>
    %cst_7 = arith.constant 1.000000e+00 : f32
    %13 = vector.broadcast %cst_7 : f32 to vector<16x4xf32>
    %14 = arith.divf %13, %12 : vector<16x4xf32>
    %cst_8 = arith.constant dense<0xFF800000> : vector<16xf32>
    %15 = vector.multi_reduction <maximumf>, %7, %cst_8 [1] : vector<16x4xf32> to vector<16xf32>
    %16 = vector.shape_cast %15 : vector<16xf32> to vector<16x1xf32>
    %17 = vector.broadcast %16 : vector<16x1xf32> to vector<16x4xf32>
    %18 = arith.subf %7, %17 : vector<16x4xf32>
    %19 = math.exp %18 : vector<16x4xf32>
    %cst_9 = arith.constant dense<0.000000e+00> : vector<16xf32>
    %20 = vector.multi_reduction <add>, %19, %cst_9 [1] : vector<16x4xf32> to vector<16xf32>
    %21 = vector.shape_cast %20 : vector<16xf32> to vector<16x1xf32>
    %22 = vector.broadcast %21 : vector<16x1xf32> to vector<16x4xf32>
    %23 = arith.divf %19, %22 : vector<16x4xf32>
    %24 = arith.mulf %14, %23 : vector<16x4xf32>
    %cst_10 = arith.constant dense<0.000000e+00> : vector<16xf32>
    %25 = vector.multi_reduction <add>, %24, %cst_10 [1] : vector<16x4xf32> to vector<16xf32>
    %26 = vector.shape_cast %25 : vector<16xf32> to vector<16x1xf32>
    %c0_11 = arith.constant 0 : index
    %c0_12 = arith.constant 0 : index
    %27 = vector.load %arg4[%c0_11, %c0_12] : memref<16x1xf32, #tpu.memory_space<vmem>>, vector<16x1xf32>
    tpu.vector_store %arg4[%c0_11, %c0_12], %26 {strides = array<i32>} : memref<16x1xf32, #tpu.memory_space<vmem>>, vector<16x1xf32>,
    return
  }
  func.func @transform_0(%arg0: i32) -> (i32, i32) {
    %c0_i32 = arith.constant 0 : i32
    %c0_i32_0 = arith.constant 0 : i32
    return %arg0, %c0_i32 : i32, i32
  }
  func.func @transform_1(%arg0: i32) -> (i32, i32) {
    %c0_i32 = arith.constant 0 : i32
    %c0_i32_0 = arith.constant 0 : i32
    %c0_i32_1 = arith.constant 0 : i32
    return %c0_i32, %c0_i32_0 : i32, i32
  }
  func.func @transform_2(%arg0: i32) -> (i32, i32) {
    %c0_i32 = arith.constant 0 : i32
    %c0_i32_0 = arith.constant 0 : i32
    %c0_i32_1 = arith.constant 0 : i32
    return %c0_i32, %c0_i32_0 : i32, i32
  }
  func.func @transform_3(%arg0: i32) -> (i32, i32) {
    %c0_i32 = arith.constant 0 : i32
    %c0_i32_0 = arith.constant 0 : i32
    return %arg0, %c0_i32 : i32, i32
  }
}

</mosaic_0001>

<bundles_post_ra>
// kernel: tpu_custom_call.1
= control target key start
LH: loop header
LB: loop body
LE: loop exit
PB: predicated region body
PF: predicated region fallthrough
CT: control target
= control target key end

     0   :  { %vm31_vm0 = vcmask 523264   ;;  %vm125_vm1 = vcmask 64544   ;;  %vm146_vm2 = vcmask 31744   ;;  %vm173_vm3 = vcmask 7168   ;;  %s311_s1 = inlined_call_operand.vmem [shape: f32[64,8], index: 1, kind: input, shape index: {}]   ;;  %s312_s0 = inlined_call_operand.vmem [shape: f32[16,64], index: 0, kind: input, shape index: {}]   ;;  %s313_s2 = inlined_call_operand.vmem [shape: f32[1,8], index: 2, kind: input, shape index: {}]   ;;  %s314_s3 = inlined_call_operand.vmem [shape: f32[16,1], index: 3, kind: output, shape index: {}]  }
   0x1   :  { %v16_v0 = vld [vmem:[%s311_s1] sm:$0xff]  ;;  %v17_v1 = vld [vmem:[%s311_s1 + $0x8] sm:$0xff]  ;;  %v18_v2 = vld [vmem:[%s311_s1 + $0x10] sm:$0xff] }
   0x2   :  { %v212_v3 = vpack.c.bf16 %v17_v1, %v16_v0  ;;  %v19_v4 = vld [vmem:[%s311_s1 + $0x18] sm:$0xff]  ;;  %v20_v6 = vld [vmem:[%s311_s1 + $0x20] sm:$0xff]  ;;  %v21_v7 = vld [vmem:[%s311_s1 + $0x28] sm:$0xff] }
   0x3   :  { %v216_v5 = vpack.c.bf16 %v19_v4, %v18_v2  ;;  %v14_v8 = vld [vmem:[%s312_s0] sm:$0xff]  ;;  %v220_v9 = vpack.c.bf16 %v21_v7, %v20_v6  ;;  %v22_v10 = vld [vmem:[%s311_s1 + $0x30] sm:$0xff]  ;;  %v23_v11 = vld [vmem:[%s311_s1 + $0x38] sm:$0xff] }
   0x4   :  { %213 = vmatprep.subr.bf16.mxu0 %v212_v3  ;;  %209 = vmatprep.mubr.msk.f32.mxu0 %vm31_vm0, %v14_v8  ;;  %v224_v12 = vpack.c.bf16 %v23_v11, %v22_v10  ;;  %v15_v13 = vld [vmem:[%s312_s0 + $0x8] sm:$0xff]  ;;  %v180_v14 = vld [vmem:[%s313_s2] ss:$0 sm:$0xff]  ;;  %s245_s0 = smov 124  }
   0x5   :  { %215 = vmatpush3.bf16.msra.mxu0 %v212_v3 }
   0x6   :  { %217 = vmatprep.subr.bf16.mxu0 %v216_v5 }
   0x9   :  { %219 = vmatpush3.bf16.msra.mxu0 %v216_v5 }
   0xa   :  { %221 = vmatprep.subr.bf16.mxu0 %v220_v9 }
   0xd   :  { %223 = vmatpush3.bf16.msra.mxu0 %v220_v9 }
   0xe   :  { %225 = vmatprep.subr.bf16.mxu0 %v224_v12 }
  0x11   :  { %227 = vmatpush3.bf16.msra.mxu0 %v224_v12 }
  0x14   :  { %210 = vmatmul.mubr.msk.f32.vlgmr.msra.gmra.mrb[0].mxu0 %vm31_vm0, %v15_v13 }
  0xe7   :  { %v211_v15 = vpop.f32.mrb[0].mxu0 }
  0xe8   :  { %v104_v16 = vpop.f32.mrb[1].mxu0  ;;  %v110_v18 = vadd.f32 %v211_v15, %v180_v14 }
  0xe9   :  { %v105_v17 = vadd.f32 %v180_v14, %v104_v16 }
  0xea   :  { %v129_v20 = vsel %vm125_vm1, %v110_v18, -inf  ;;  %v114_v40 = vsub.f32 0.0, %v110_v18 }
  0xeb   :  { %v126_v19 = vsel %vm125_vm1, %v105_v17, -inf  ;;  %v113_v39 = vsub.f32 0.0, %v105_v17 }
  0xec   :  { %127 = vmax.xlane.f32.xlu0 %v126_v19  ;;  %v117_v42 = vmul.f32 1.442695, %v114_v40 }
  0xed   :  { %v115_v41 = vmul.f32 1.442695, %v113_v39 }
  0xf0   :  { %130 = vmax.xlane.f32.xlu0 %v129_v20 }
 0x179   :  { %v128_v21 = vpop.xlane.xlu0 %127 }
 0x17a   :  { %v132_v22 = vsub.f32 %v105_v17, %v128_v21 }
 0x17c   :  { %v134_v23 = vmul.f32 1.442695, %v132_v22 }
 0x17d   :  { %v131_v24 = vpop.xlane.xlu0 %130 }
 0x17e   :  { %229 = vpow2.f32 %v134_v23  ;;  %v133_v25 = vsub.f32 %v110_v18, %v131_v24 }
 0x180   :  { %v136_v26 = vmul.f32 1.442695, %v133_v25 }
 0x182   :  { %231 = vpow2.f32 %v136_v26 }
 0x188   :  { %v230_v27 = vpop.eup %229 }
 0x189   :  { %140 = vrot.lane.b32.xlu1 %v230_v27, %s245_s0 }
 0x18c   :  { %v232_v28 = vpop.eup %231 }
 0x18d   :  { %142 = vrot.lane.b32.xlu1 %v232_v28, %s245_s0 }
 0x1fb   :  { %v141_v29 = vpop.permute.xlu1 %140 }
 0x1fc   :  { %v147_v30 = vsel %vm146_vm2, %v141_v29, 0.0 }
 0x1fd   :  { %148 = vadd.xlane.f32.xlu0 %v147_v30 }
 0x1ff   :  { %v143_v31 = vpop.permute.xlu1 %142 }
 0x200   :  { %v150_v32 = vsel %vm146_vm2, %v143_v31, 0.0 }
 0x201   :  { %151 = vadd.xlane.f32.xlu1 %v150_v32 }
 0x28a   :  { %v149_v33 = vpop.xlane.xlu0 %148 }
 0x28b   :  { %233 = vrcp.f32 %v149_v33 }
 0x28e   :  { %v152_v34 = vpop.xlane.xlu1 %151 }
 0x28f   :  { %235 = vrcp.f32 %v152_v34 }
 0x290   :  { %237 = vpow2.f32 %v115_v41 }
 0x291   :  { %239 = vpow2.f32 %v117_v42 }
 0x295   :  { %v234_v35 = vpop.eup %233 }
 0x296   :  { %v154_v36 = vmul.f32 %v234_v35, %v230_v27 }
 0x298   :  { %159 = vrot.lane.b32.xlu0 %v154_v36, %s245_s0 }
 0x299   :  { %v236_v37 = vpop.eup %235 }
 0x29a   :  { %v156_v38 = vmul.f32 %v236_v37, %v232_v28  ;;  %v238_v43 = vpop.eup %237 }
 0x29b   :  { %v119_v44 = vadd.f32 1.0, %v238_v43  ;;  %v240_v45 = vpop.eup %239 }
 0x29c   :  { %161 = vrot.lane.b32.xlu0 %v156_v38, %s245_s0  ;;  %v120_v46 = vadd.f32 1.0, %v240_v45 }
 0x29d   :  { %241 = vrcp.f32 %v119_v44 }
 0x29e   :  { %243 = vrcp.f32 %v120_v46 }
 0x2a7   :  { %v242_v47 = vpop.eup %241 }
 0x2a8   :  { %v244_v51 = vpop.eup %243 }
 0x30a   :  { %v160_v48 = vpop.permute.xlu0 %159 }
 0x30b   :  { %v165_v49 = vmul.f32 %v242_v47, %v160_v48 }
 0x30d   :  { %v167_v50 = vsel %vm146_vm2, %v165_v49, 0.0 }
 0x30e   :  { %v162_v52 = vpop.permute.xlu0 %161  ;;  %168 = vadd.xlane.f32.xlu0 %v167_v50 }
 0x30f   :  { %v166_v53 = vmul.f32 %v244_v51, %v162_v52 }
 0x311   :  { %v170_v54 = vsel %vm146_vm2, %v166_v53, 0.0 }
 0x312   :  { %171 = vadd.xlane.f32.xlu1 %v170_v54 }
 0x39b   :  { %v169_v55 = vpop.xlane.xlu0 %168 }
 0x39c   :  { %174 = vst.msk [vmem:[%s314_s3] sm:$0xff] %vm173_vm3, %v169_v55 }
 0x39f   :  { %v172_v56 = vpop.xlane.xlu1 %171 }
 0x3a0   :  { %175 = vst.msk [vmem:[%s314_s3 + $0x8] sm:$0xff] %vm173_vm3, %v172_v56 }

</bundles_post_ra>
